<compile_context>
chip_gen: v5e
topology: v5e:2x2
jax: 0.10.0
libtpu: 0.0.40
codegen_flags: <defaults>
</compile_context>

<pallas_src>
import jax
import jax.numpy as jnp
import numpy as np
from jax import lax
from jax.experimental import pallas as pl
from jax.experimental.pallas import tpu as pltpu


def _round_up(x, m):
    return (x + m - 1) // m * m


def _char_decoder_kernel(x_ref, wih_ref, whh_ref, b_ref, wout_ref, bout_ref,
                         h0_ref, c0_ref,
                         scores_ref, hN_ref, cN_ref,
                         h_all_scr):
    Bp, H = h0_ref.shape
    LBp = x_ref.shape[0]
    L = LBp // Bp

    # (1) Hoisted input projection for ALL time steps: one big MXU matmul,
    #     bias (b_ih + b_hh) added once.
    gates_x = (jnp.dot(x_ref[...], wih_ref[...],
                       preferred_element_type=jnp.float32)
               + b_ref[...])                          # (L*Bp, 4H)

    w_hh = whh_ref[...]                               # hoisted weight load
    h = h0_ref[...]                                   # (Bp, H)
    c = c0_ref[...]                                   # (Bp, H)

    # (2) Serial LSTM recurrence. L is a small static trip count, so it is
    #     fully unrolled at trace time (single basic block, scheduler-visible).
    #     Only h @ W_hh and the gate nonlinearities remain on the serial path.
    for t in range(L):
        g = gates_x[t * Bp:(t + 1) * Bp, :] + jnp.dot(
            h, w_hh, preferred_element_type=jnp.float32)          # (Bp, 4H)
        # PyTorch gate order [i, f, g, o]; 4H = lane dimension.
        i_g = jax.nn.sigmoid(g[:, 0 * H:1 * H])
        f_g = jax.nn.sigmoid(g[:, 1 * H:2 * H])
        g_g = jnp.tanh(g[:, 2 * H:3 * H])
        o_g = jax.nn.sigmoid(g[:, 3 * H:4 * H])
        c = f_g * c + i_g * g_g
        h = o_g * jnp.tanh(c)
        # Static, sublane-aligned (Bp multiple of 8) store of this step's h.
        h_all_scr[t * Bp:(t + 1) * Bp, :] = h

    hN_ref[...] = h
    cN_ref[...] = c

    # (3) Hoisted output projection: one (L*Bp, H) @ (H, Vp) matmul + bias,
    #     written as a single lane-dense (Vp multiple of 128) store.
    scores_ref[...] = (jnp.dot(h_all_scr[...], wout_ref[...],
                               preferred_element_type=jnp.float32)
                       + bout_ref[...])


def char_decoder_forward(input_ids, params, dec_hidden=None):
    """input_ids: (L, B) int32. Returns (scores (L,B,V), (h_n, c_n) each (1,B,H))."""
    emb_table = params["emb"]          # (V, E)
    w_ih_T = params["w_ih_T"]          # (E, 4H)
    w_hh_T = params["w_hh_T"]          # (H, 4H)
    b_lstm = params["b_lstm"]          # (1, 4H)  == b_ih + b_hh
    w_out_T = params["w_out_T"]        # (H, V)
    b_out = params["b_out"]            # (1, V)

    L, B = input_ids.shape
    E = emb_table.shape[1]
    H = w_hh_T.shape[0]
    V = w_out_T.shape[1]

    Bp = _round_up(B, 8)               # sublane-pad batch
    Vp = _round_up(V, 128)             # lane-pad vocab (output projection)

    if dec_hidden is None:
        h0 = jnp.zeros((1, B, H), jnp.float32)
        c0 = jnp.zeros((1, B, H), jnp.float32)
    else:
        h0, c0 = dec_hidden

    # Embedding lookup (glue, plain JAX). padding_idx row is zero in the table.
    x_emb = emb_table[input_ids]       # (L, B, E)

    # Pad batch dimension; padded rows carry zeros and are sliced away below.
    if Bp != B:
        x_emb = jnp.pad(x_emb, ((0, 0), (0, Bp - B), (0, 0)))
        h0p = jnp.pad(h0[0], ((0, Bp - B), (0, 0)))
        c0p = jnp.pad(c0[0], ((0, Bp - B), (0, 0)))
    else:
        h0p, c0p = h0[0], c0[0]
    x_flat = x_emb.reshape(L * Bp, E)

    # Lane-pad output projection weights/bias to Vp.
    if Vp != V:
        w_out_p = jnp.pad(w_out_T, ((0, 0), (0, Vp - V)))
        b_out_p = jnp.pad(b_out, ((0, 0), (0, Vp - V)))
    else:
        w_out_p, b_out_p = w_out_T, b_out

    full = lambda shape: pl.BlockSpec(shape, lambda i: (0,) * len(shape))

    scores_flat, h_n_p, c_n_p = pl.pallas_call(
        _char_decoder_kernel,
        out_shape=(
            jax.ShapeDtypeStruct((L * Bp, Vp), jnp.float32),
            jax.ShapeDtypeStruct((Bp, H), jnp.float32),
            jax.ShapeDtypeStruct((Bp, H), jnp.float32),
        ),
        grid=(1,),                                     # single invocation
        in_specs=[
            full((L * Bp, E)),        # all embeddings at once
            full((E, 4 * H)),
            full((H, 4 * H)),
            full((1, 4 * H)),
            full((H, Vp)),
            full((1, Vp)),
            full((Bp, H)),
            full((Bp, H)),
        ],
        out_specs=(
            full((L * Bp, Vp)),       # lane-dense scores slab
            full((Bp, H)),
            full((Bp, H)),
        ),
        scratch_shapes=[
            pltpu.VMEM((L * Bp, H), jnp.float32),      # all h_t, for one out-proj
        ],
        compiler_params=pltpu.CompilerParams(
            dimension_semantics=("arbitrary",),
        ),
    )(x_flat, w_ih_T, w_hh_T, b_lstm, w_out_p, b_out_p, h0p, c0p)

    scores = scores_flat.reshape(L, Bp, Vp)[:, :B, :V]
    h_n = h_n_p[:B][None]              # (1, B, H)
    c_n = c_n_p[:B][None]
    return scores, (h_n, c_n)


def _reference_forward(input_ids, params, dec_hidden):
    """Pure-JAX reference (lax.scan LSTM) mirroring PyTorch semantics."""
    emb = params["emb"][input_ids]                     # (L, B, E)
    H = params["w_hh_T"].shape[0]
    h0, c0 = dec_hidden
    h0, c0 = h0[0], c0[0]

    def step(carry, x_t):
        h, c = carry
        gates = x_t @ params["w_ih_T"] + h @ params["w_hh_T"] + params["b_lstm"]
        i = jax.nn.sigmoid(gates[:, :H])
        f = jax.nn.sigmoid(gates[:, H:2 * H])
        g = jnp.tanh(gates[:, 2 * H:3 * H])
        o = jax.nn.sigmoid(gates[:, 3 * H:])
        c_new = f * c + i * g
        h_new = o * jnp.tanh(c_new)
        return (h_new, c_new), h_new

    (h_n, c_n), outs = lax.scan(step, (h0, c0), emb)
    scores = outs @ params["w_out_T"] + params["b_out"]
    return scores, (h_n[None], c_n[None])


def make_params(key, vocab_size, char_emb_size, hidden_size, pad_idx=0):
    ks = jax.random.split(key, 7)
    H, E, V = hidden_size, char_emb_size, vocab_size
    k_lstm = 1.0 / np.sqrt(H)
    k_lin = 1.0 / np.sqrt(H)

    # nn.Embedding: N(0,1), padding_idx row zeroed
    emb = jax.random.normal(ks[0], (V, E), jnp.float32)
    emb = emb.at[pad_idx].set(0.0)

    # nn.LSTM weights, stored transposed for x @ W layouts; gate order [i,f,g,o]
    w_ih = jax.random.uniform(ks[1], (4 * H, E), jnp.float32, -k_lstm, k_lstm)
    w_hh = jax.random.uniform(ks[2], (4 * H, H), jnp.float32, -k_lstm, k_lstm)
    b_ih = jax.random.uniform(ks[3], (4 * H,), jnp.float32, -k_lstm, k_lstm)
    b_hh = jax.random.uniform(ks[4], (4 * H,), jnp.float32, -k_lstm, k_lstm)

    # nn.Linear(H -> V)
    w_out = jax.random.uniform(ks[5], (V, H), jnp.float32, -k_lin, k_lin)
    b_out = jax.random.uniform(ks[6], (V,), jnp.float32, -k_lin, k_lin)

    return {
        "emb": emb,
        "w_ih_T": w_ih.T,                      # (E, 4H)
        "w_hh_T": w_hh.T,                      # (H, 4H)
        "b_lstm": (b_ih + b_hh)[None, :],      # (1, 4H)
        "w_out_T": w_out.T,                    # (H, V)
        "b_out": b_out[None, :],               # (1, V)
    }


if __name__ == "__main__":
    L, B = 8, 4                 # (length, batch)
    HIDDEN = 32
    CHAR_EMB = 50
    VOCAB = 30                  # len(target_vocab.char2id), synthetic
    PAD_IDX = 0

    key = jax.random.PRNGKey(0)
    k_p, k_in, k_h, k_c = jax.random.split(key, 4)

    params = make_params(k_p, VOCAB, CHAR_EMB, HIDDEN, pad_idx=PAD_IDX)
    input_ids = jax.random.randint(k_in, (L, B), 0, VOCAB, dtype=jnp.int32)
    h0 = jax.random.normal(k_h, (1, B, HIDDEN), jnp.float32)
    c0 = jax.random.normal(k_c, (1, B, HIDDEN), jnp.float32)

    scores, (h_n, c_n) = char_decoder_forward(input_ids, params, (h0, c0))
    jax.block_until_ready(scores)
    jax.block_until_ready(h_n)
    jax.block_until_ready(c_n)

    # Verify against pure-JAX reference.
    ref_scores, (ref_h, ref_c) = _reference_forward(input_ids, params, (h0, c0))
    np.testing.assert_allclose(np.asarray(scores), np.asarray(ref_scores), rtol=1e-5, atol=1e-5)
    np.testing.assert_allclose(np.asarray(h_n), np.asarray(ref_h), rtol=1e-5, atol=1e-5)
    np.testing.assert_allclose(np.asarray(c_n), np.asarray(ref_c), rtol=1e-5, atol=1e-5)

    assert scores.shape == (L, B, VOCAB)
    assert h_n.shape == (1, B, HIDDEN) and c_n.shape == (1, B, HIDDEN)
    print("KERNEL_OK")
</pallas_src>

<mosaic_0001>
module attributes {stable_mosaic.version = 11 : i64} {
  func.func @_char_decoder_kernel(%arg0: i32, %arg1: memref<64x50xf32, #tpu.memory_space<vmem>>, %arg2: memref<50x128xf32, #tpu.memory_space<vmem>>, %arg3: memref<32x128xf32, #tpu.memory_space<vmem>>, %arg4: memref<1x128xf32, #tpu.memory_space<vmem>>, %arg5: memref<32x128xf32, #tpu.memory_space<vmem>>, %arg6: memref<1x128xf32, #tpu.memory_space<vmem>>, %arg7: memref<8x32xf32, #tpu.memory_space<vmem>>, %arg8: memref<8x32xf32, #tpu.memory_space<vmem>>, %arg9: memref<64x128xf32, #tpu.memory_space<vmem>>, %arg10: memref<8x32xf32, #tpu.memory_space<vmem>>, %arg11: memref<8x32xf32, #tpu.memory_space<vmem>>, %arg12: memref<64x32xf32, #tpu.memory_space<vmem>>) attributes {dimension_semantics = [#tpu.dimension_semantics<arbitrary>], iteration_bounds = array<i64: 1>, scalar_prefetch = 0 : i64, scratch_operands = 1 : i64, tpu.core_type = #tpu.core_type<tc>, window_params = [{pipeline_mode = #tpu.pipeline_mode<synchronous>, transform_indices = @transform_0, window_bounds = array<i64: 64, 50>}, {pipeline_mode = #tpu.pipeline_mode<synchronous>, transform_indices = @transform_1, window_bounds = array<i64: 50, 128>}, {pipeline_mode = #tpu.pipeline_mode<synchronous>, transform_indices = @transform_2, window_bounds = array<i64: 32, 128>}, {pipeline_mode = #tpu.pipeline_mode<synchronous>, transform_indices = @transform_3, window_bounds = array<i64: 1, 128>}, {pipeline_mode = #tpu.pipeline_mode<synchronous>, transform_indices = @transform_4, window_bounds = array<i64: 32, 128>}, {pipeline_mode = #tpu.pipeline_mode<synchronous>, transform_indices = @transform_5, window_bounds = array<i64: 1, 128>}, {pipeline_mode = #tpu.pipeline_mode<synchronous>, transform_indices = @transform_6, window_bounds = array<i64: 8, 32>}, {pipeline_mode = #tpu.pipeline_mode<synchronous>, transform_indices = @transform_7, window_bounds = array<i64: 8, 32>}, {pipeline_mode = #tpu.pipeline_mode<synchronous>, transform_indices = @transform_8, window_bounds = array<i64: 64, 128>}, {pipeline_mode = #tpu.pipeline_mode<synchronous>, transform_indices = @transform_9, window_bounds = array<i64: 8, 32>}, {pipeline_mode = #tpu.pipeline_mode<synchronous>, transform_indices = @transform_10, window_bounds = array<i64: 8, 32>}]} {
    %c0 = arith.constant 0 : index
    %c0_0 = arith.constant 0 : index
    %0 = vector.load %arg1[%c0, %c0_0] : memref<64x50xf32, #tpu.memory_space<vmem>>, vector<64x50xf32>
    %c0_1 = arith.constant 0 : index
    %c0_2 = arith.constant 0 : index
    %1 = vector.load %arg2[%c0_1, %c0_2] : memref<50x128xf32, #tpu.memory_space<vmem>>, vector<50x128xf32>
    %cst = arith.constant dense<0.000000e+00> : vector<64x128xf32>
    %2 = tpu.matmul %0, %1, %cst {dimension_numbers = #tpu.dot_dimension_numbers<[1], [0], [0], [1], [0, 0, 1, 1], [], []>} : vector<64x50xf32>, vector<50x128xf32>, vector<64x128xf32> -> vector<64x128xf32>
    %c0_3 = arith.constant 0 : index
    %c0_4 = arith.constant 0 : index
    %3 = vector.load %arg4[%c0_3, %c0_4] : memref<1x128xf32, #tpu.memory_space<vmem>>, vector<1x128xf32>
    %4 = vector.broadcast %3 : vector<1x128xf32> to vector<64x128xf32>
    %5 = arith.addf %2, %4 : vector<64x128xf32>
    %c0_5 = arith.constant 0 : index
    %c0_6 = arith.constant 0 : index
    %6 = vector.load %arg3[%c0_5, %c0_6] : memref<32x128xf32, #tpu.memory_space<vmem>>, vector<32x128xf32>
    %c0_7 = arith.constant 0 : index
    %c0_8 = arith.constant 0 : index
    %7 = vector.load %arg7[%c0_7, %c0_8] : memref<8x32xf32, #tpu.memory_space<vmem>>, vector<8x32xf32>
    %c0_9 = arith.constant 0 : index
    %c0_10 = arith.constant 0 : index
    %8 = vector.load %arg8[%c0_9, %c0_10] : memref<8x32xf32, #tpu.memory_space<vmem>>, vector<8x32xf32>
    %9 = vector.extract_strided_slice %5 {offsets = [0, 0], sizes = [8, 128], strides = [1, 1]} : vector<64x128xf32> to vector<8x128xf32>
    %cst_11 = arith.constant dense<0.000000e+00> : vector<8x128xf32>
    %10 = tpu.matmul %7, %6, %cst_11 {dimension_numbers = #tpu.dot_dimension_numbers<[1], [0], [0], [1], [0, 0, 1, 1], [], []>} : vector<8x32xf32>, vector<32x128xf32>, vector<8x128xf32> -> vector<8x128xf32>
    %11 = arith.addf %9, %10 : vector<8x128xf32>
    %12 = vector.extract_strided_slice %11 {offsets = [0, 0], sizes = [8, 32], strides = [1, 1]} : vector<8x128xf32> to vector<8x32xf32>
    %13 = arith.negf %12 : vector<8x32xf32>
    %14 = math.exp %13 : vector<8x32xf32>
    %cst_12 = arith.constant 1.000000e+00 : f32
    %15 = vector.broadcast %cst_12 : f32 to vector<8x32xf32>
    %16 = arith.addf %15, %14 : vector<8x32xf32>
    %17 = arith.divf %15, %16 : vector<8x32xf32>
    %18 = vector.extract_strided_slice %11 {offsets = [0, 32], sizes = [8, 32], strides = [1, 1]} : vector<8x128xf32> to vector<8x32xf32>
    %19 = arith.negf %18 : vector<8x32xf32>
    %20 = math.exp %19 : vector<8x32xf32>
    %cst_13 = arith.constant 1.000000e+00 : f32
    %21 = vector.broadcast %cst_13 : f32 to vector<8x32xf32>
    %22 = arith.addf %21, %20 : vector<8x32xf32>
    %23 = arith.divf %21, %22 : vector<8x32xf32>
    %24 = vector.extract_strided_slice %11 {offsets = [0, 64], sizes = [8, 32], strides = [1, 1]} : vector<8x128xf32> to vector<8x32xf32>
    %25 = math.tanh %24 : vector<8x32xf32>
    %26 = vector.extract_strided_slice %11 {offsets = [0, 96], sizes = [8, 32], strides = [1, 1]} : vector<8x128xf32> to vector<8x32xf32>
    %27 = arith.negf %26 : vector<8x32xf32>
    %28 = math.exp %27 : vector<8x32xf32>
    %cst_14 = arith.constant 1.000000e+00 : f32
    %29 = vector.broadcast %cst_14 : f32 to vector<8x32xf32>
    %30 = arith.addf %29, %28 : vector<8x32xf32>
    %31 = arith.divf %29, %30 : vector<8x32xf32>
    %32 = arith.mulf %23, %8 : vector<8x32xf32>
    %33 = arith.mulf %17, %25 : vector<8x32xf32>
    %34 = arith.addf %32, %33 : vector<8x32xf32>
    %35 = math.tanh %34 : vector<8x32xf32>
    %36 = arith.mulf %31, %35 : vector<8x32xf32>
    %c0_15 = arith.constant 0 : index
    %c0_16 = arith.constant 0 : index
    %37 = vector.load %arg12[%c0_15, %c0_16] : memref<64x32xf32, #tpu.memory_space<vmem>>, vector<8x32xf32>
    tpu.vector_store %arg12[%c0_15, %c0_16], %36 {strides = array<i32>} : memref<64x32xf32, #tpu.memory_space<vmem>>, vector<8x32xf32>,
    %38 = vector.extract_strided_slice %5 {offsets = [8, 0], sizes = [8, 128], strides = [1, 1]} : vector<64x128xf32> to vector<8x128xf32>
    %cst_17 = arith.constant dense<0.000000e+00> : vector<8x128xf32>
    %39 = tpu.matmul %36, %6, %cst_17 {dimension_numbers = #tpu.dot_dimension_numbers<[1], [0], [0], [1], [0, 0, 1, 1], [], []>} : vector<8x32xf32>, vector<32x128xf32>, vector<8x128xf32> -> vector<8x128xf32>
    %40 = arith.addf %38, %39 : vector<8x128xf32>
    %41 = vector.extract_strided_slice %40 {offsets = [0, 0], sizes = [8, 32], strides = [1, 1]} : vector<8x128xf32> to vector<8x32xf32>
    %42 = arith.negf %41 : vector<8x32xf32>
    %43 = math.exp %42 : vector<8x32xf32>
    %cst_18 = arith.constant 1.000000e+00 : f32
    %44 = vector.broadcast %cst_18 : f32 to vector<8x32xf32>
    %45 = arith.addf %44, %43 : vector<8x32xf32>
    %46 = arith.divf %44, %45 : vector<8x32xf32>
    %47 = vector.extract_strided_slice %40 {offsets = [0, 32], sizes = [8, 32], strides = [1, 1]} : vector<8x128xf32> to vector<8x32xf32>
    %48 = arith.negf %47 : vector<8x32xf32>
    %49 = math.exp %48 : vector<8x32xf32>
    %cst_19 = arith.constant 1.000000e+00 : f32
    %50 = vector.broadcast %cst_19 : f32 to vector<8x32xf32>
    %51 = arith.addf %50, %49 : vector<8x32xf32>
    %52 = arith.divf %50, %51 : vector<8x32xf32>
    %53 = vector.extract_strided_slice %40 {offsets = [0, 64], sizes = [8, 32], strides = [1, 1]} : vector<8x128xf32> to vector<8x32xf32>
    %54 = math.tanh %53 : vector<8x32xf32>
    %55 = vector.extract_strided_slice %40 {offsets = [0, 96], sizes = [8, 32], strides = [1, 1]} : vector<8x128xf32> to vector<8x32xf32>
    %56 = arith.negf %55 : vector<8x32xf32>
    %57 = math.exp %56 : vector<8x32xf32>
    %cst_20 = arith.constant 1.000000e+00 : f32
    %58 = vector.broadcast %cst_20 : f32 to vector<8x32xf32>
    %59 = arith.addf %58, %57 : vector<8x32xf32>
    %60 = arith.divf %58, %59 : vector<8x32xf32>
    %61 = arith.mulf %52, %34 : vector<8x32xf32>
    %62 = arith.mulf %46, %54 : vector<8x32xf32>
    %63 = arith.addf %61, %62 : vector<8x32xf32>
    %64 = math.tanh %63 : vector<8x32xf32>
    %65 = arith.mulf %60, %64 : vector<8x32xf32>
    %c8 = arith.constant 8 : index
    %c0_21 = arith.constant 0 : index
    %66 = vector.load %arg12[%c8, %c0_21] : memref<64x32xf32, #tpu.memory_space<vmem>>, vector<8x32xf32>
    tpu.vector_store %arg12[%c8, %c0_21], %65 {strides = array<i32>} : memref<64x32xf32, #tpu.memory_space<vmem>>, vector<8x32xf32>,
    %67 = vector.extract_strided_slice %5 {offsets = [16, 0], sizes = [8, 128], strides = [1, 1]} : vector<64x128xf32> to vector<8x128xf32>
    %cst_22 = arith.constant dense<0.000000e+00> : vector<8x128xf32>
    %68 = tpu.matmul %65, %6, %cst_22 {dimension_numbers = #tpu.dot_dimension_numbers<[1], [0], [0], [1], [0, 0, 1, 1], [], []>} : vector<8x32xf32>, vector<32x128xf32>, vector<8x128xf32> -> vector<8x128xf32>
    %69 = arith.addf %67, %68 : vector<8x128xf32>
    %70 = vector.extract_strided_slice %69 {offsets = [0, 0], sizes = [8, 32], strides = [1, 1]} : vector<8x128xf32> to vector<8x32xf32>
    %71 = arith.negf %70 : vector<8x32xf32>
    %72 = math.exp %71 : vector<8x32xf32>
    %cst_23 = arith.constant 1.000000e+00 : f32
    %73 = vector.broadcast %cst_23 : f32 to vector<8x32xf32>
    %74 = arith.addf %73, %72 : vector<8x32xf32>
    %75 = arith.divf %73, %74 : vector<8x32xf32>
    %76 = vector.extract_strided_slice %69 {offsets = [0, 32], sizes = [8, 32], strides = [1, 1]} : vector<8x128xf32> to vector<8x32xf32>
    %77 = arith.negf %76 : vector<8x32xf32>
    %78 = math.exp %77 : vector<8x32xf32>
    %cst_24 = arith.constant 1.000000e+00 : f32
    %79 = vector.broadcast %cst_24 : f32 to vector<8x32xf32>
    %80 = arith.addf %79, %78 : vector<8x32xf32>
    %81 = arith.divf %79, %80 : vector<8x32xf32>
    %82 = vector.extract_strided_slice %69 {offsets = [0, 64], sizes = [8, 32], strides = [1, 1]} : vector<8x128xf32> to vector<8x32xf32>
    %83 = math.tanh %82 : vector<8x32xf32>
    %84 = vector.extract_strided_slice %69 {offsets = [0, 96], sizes = [8, 32], strides = [1, 1]} : vector<8x128xf32> to vector<8x32xf32>
    %85 = arith.negf %84 : vector<8x32xf32>
    %86 = math.exp %85 : vector<8x32xf32>
    %cst_25 = arith.constant 1.000000e+00 : f32
    %87 = vector.broadcast %cst_25 : f32 to vector<8x32xf32>
    %88 = arith.addf %87, %86 : vector<8x32xf32>
    %89 = arith.divf %87, %88 : vector<8x32xf32>
    %90 = arith.mulf %81, %63 : vector<8x32xf32>
    %91 = arith.mulf %75, %83 : vector<8x32xf32>
    %92 = arith.addf %90, %91 : vector<8x32xf32>
    %93 = math.tanh %92 : vector<8x32xf32>
    %94 = arith.mulf %89, %93 : vector<8x32xf32>
    %c16 = arith.constant 16 : index
    %c0_26 = arith.constant 0 : index
    %95 = vector.load %arg12[%c16, %c0_26] : memref<64x32xf32, #tpu.memory_space<vmem>>, vector<8x32xf32>
    tpu.vector_store %arg12[%c16, %c0_26], %94 {strides = array<i32>} : memref<64x32xf32, #tpu.memory_space<vmem>>, vector<8x32xf32>,
    %96 = vector.extract_strided_slice %5 {offsets = [24, 0], sizes = [8, 128], strides = [1, 1]} : vector<64x128xf32> to vector<8x128xf32>
    %cst_27 = arith.constant dense<0.000000e+00> : vector<8x128xf32>
    %97 = tpu.matmul %94, %6, %cst_27 {dimension_numbers = #tpu.dot_dimension_numbers<[1], [0], [0], [1], [0, 0, 1, 1], [], []>} : vector<8x32xf32>, vector<32x128xf32>, vector<8x128xf32> -> vector<8x128xf32>
    %98 = arith.addf %96, %97 : vector<8x128xf32>
    %99 = vector.extract_strided_slice %98 {offsets = [0, 0], sizes = [8, 32], strides = [1, 1]} : vector<8x128xf32> to vector<8x32xf32>
    %100 = arith.negf %99 : vector<8x32xf32>
    %101 = math.exp %100 : vector<8x32xf32>
    %cst_28 = arith.constant 1.000000e+00 : f32
    %102 = vector.broadcast %cst_28 : f32 to vector<8x32xf32>
    %103 = arith.addf %102, %101 : vector<8x32xf32>
    %104 = arith.divf %102, %103 : vector<8x32xf32>
    %105 = vector.extract_strided_slice %98 {offsets = [0, 32], sizes = [8, 32], strides = [1, 1]} : vector<8x128xf32> to vector<8x32xf32>
    %106 = arith.negf %105 : vector<8x32xf32>
    %107 = math.exp %106 : vector<8x32xf32>
    %cst_29 = arith.constant 1.000000e+00 : f32
    %108 = vector.broadcast %cst_29 : f32 to vector<8x32xf32>
    %109 = arith.addf %108, %107 : vector<8x32xf32>
    %110 = arith.divf %108, %109 : vector<8x32xf32>
    %111 = vector.extract_strided_slice %98 {offsets = [0, 64], sizes = [8, 32], strides = [1, 1]} : vector<8x128xf32> to vector<8x32xf32>
    %112 = math.tanh %111 : vector<8x32xf32>
    %113 = vector.extract_strided_slice %98 {offsets = [0, 96], sizes = [8, 32], strides = [1, 1]} : vector<8x128xf32> to vector<8x32xf32>
    %114 = arith.negf %113 : vector<8x32xf32>
    %115 = math.exp %114 : vector<8x32xf32>
    %cst_30 = arith.constant 1.000000e+00 : f32
    %116 = vector.broadcast %cst_30 : f32 to vector<8x32xf32>
    %117 = arith.addf %116, %115 : vector<8x32xf32>
    %118 = arith.divf %116, %117 : vector<8x32xf32>
    %119 = arith.mulf %110, %92 : vector<8x32xf32>
    %120 = arith.mulf %104, %112 : vector<8x32xf32>
    %121 = arith.addf %119, %120 : vector<8x32xf32>
    %122 = math.tanh %121 : vector<8x32xf32>
    %123 = arith.mulf %118, %122 : vector<8x32xf32>
    %c24 = arith.constant 24 : index
    %c0_31 = arith.constant 0 : index
    %124 = vector.load %arg12[%c24, %c0_31] : memref<64x32xf32, #tpu.memory_space<vmem>>, vector<8x32xf32>
    tpu.vector_store %arg12[%c24, %c0_31], %123 {strides = array<i32>} : memref<64x32xf32, #tpu.memory_space<vmem>>, vector<8x32xf32>,
    %125 = vector.extract_strided_slice %5 {offsets = [32, 0], sizes = [8, 128], strides = [1, 1]} : vector<64x128xf32> to vector<8x128xf32>
    %cst_32 = arith.constant dense<0.000000e+00> : vector<8x128xf32>
    %126 = tpu.matmul %123, %6, %cst_32 {dimension_numbers = #tpu.dot_dimension_numbers<[1], [0], [0], [1], [0, 0, 1, 1], [], []>} : vector<8x32xf32>, vector<32x128xf32>, vector<8x128xf32> -> vector<8x128xf32>
    %127 = arith.addf %125, %126 : vector<8x128xf32>
    %128 = vector.extract_strided_slice %127 {offsets = [0, 0], sizes = [8, 32], strides = [1, 1]} : vector<8x128xf32> to vector<8x32xf32>
    %129 = arith.negf %128 : vector<8x32xf32>
    %130 = math.exp %129 : vector<8x32xf32>
    %cst_33 = arith.constant 1.000000e+00 : f32
    %131 = vector.broadcast %cst_33 : f32 to vector<8x32xf32>
    %132 = arith.addf %131, %130 : vector<8x32xf32>
    %133 = arith.divf %131, %132 : vector<8x32xf32>
    %134 = vector.extract_strided_slice %127 {offsets = [0, 32], sizes = [8, 32], strides = [1, 1]} : vector<8x128xf32> to vector<8x32xf32>
    %135 = arith.negf %134 : vector<8x32xf32>
    %136 = math.exp %135 : vector<8x32xf32>
    %cst_34 = arith.constant 1.000000e+00 : f32
    %137 = vector.broadcast %cst_34 : f32 to vector<8x32xf32>
    %138 = arith.addf %137, %136 : vector<8x32xf32>
    %139 = arith.divf %137, %138 : vector<8x32xf32>
    %140 = vector.extract_strided_slice %127 {offsets = [0, 64], sizes = [8, 32], strides = [1, 1]} : vector<8x128xf32> to vector<8x32xf32>
    %141 = math.tanh %140 : vector<8x32xf32>
    %142 = vector.extract_strided_slice %127 {offsets = [0, 96], sizes = [8, 32], strides = [1, 1]} : vector<8x128xf32> to vector<8x32xf32>
    %143 = arith.negf %142 : vector<8x32xf32>
    %144 = math.exp %143 : vector<8x32xf32>
    %cst_35 = arith.constant 1.000000e+00 : f32
    %145 = vector.broadcast %cst_35 : f32 to vector<8x32xf32>
    %146 = arith.addf %145, %144 : vector<8x32xf32>
    %147 = arith.divf %145, %146 : vector<8x32xf32>
    %148 = arith.mulf %139, %121 : vector<8x32xf32>
    %149 = arith.mulf %133, %141 : vector<8x32xf32>
    %150 = arith.addf %148, %149 : vector<8x32xf32>
    %151 = math.tanh %150 : vector<8x32xf32>
    %152 = arith.mulf %147, %151 : vector<8x32xf32>
    %c32 = arith.constant 32 : index
    %c0_36 = arith.constant 0 : index
    %153 = vector.load %arg12[%c32, %c0_36] : memref<64x32xf32, #tpu.memory_space<vmem>>, vector<8x32xf32>
    tpu.vector_store %arg12[%c32, %c0_36], %152 {strides = array<i32>} : memref<64x32xf32, #tpu.memory_space<vmem>>, vector<8x32xf32>,
    %154 = vector.extract_strided_slice %5 {offsets = [40, 0], sizes = [8, 128], strides = [1, 1]} : vector<64x128xf32> to vector<8x128xf32>
    %cst_37 = arith.constant dense<0.000000e+00> : vector<8x128xf32>
    %155 = tpu.matmul %152, %6, %cst_37 {dimension_numbers = #tpu.dot_dimension_numbers<[1], [0], [0], [1], [0, 0, 1, 1], [], []>} : vector<8x32xf32>, vector<32x128xf32>, vector<8x128xf32> -> vector<8x128xf32>
    %156 = arith.addf %154, %155 : vector<8x128xf32>
    %157 = vector.extract_strided_slice %156 {offsets = [0, 0], sizes = [8, 32], strides = [1, 1]} : vector<8x128xf32> to vector<8x32xf32>
    %158 = arith.negf %157 : vector<8x32xf32>
    %159 = math.exp %158 : vector<8x32xf32>
    %cst_38 = arith.constant 1.000000e+00 : f32
    %160 = vector.broadcast %cst_38 : f32 to vector<8x32xf32>
    %161 = arith.addf %160, %159 : vector<8x32xf32>
    %162 = arith.divf %160, %161 : vector<8x32xf32>
    %163 = vector.extract_strided_slice %156 {offsets = [0, 32], sizes = [8, 32], strides = [1, 1]} : vector<8x128xf32> to vector<8x32xf32>
    %164 = arith.negf %163 : vector<8x32xf32>
    %165 = math.exp %164 : vector<8x32xf32>
    %cst_39 = arith.constant 1.000000e+00 : f32
    %166 = vector.broadcast %cst_39 : f32 to vector<8x32xf32>
    %167 = arith.addf %166, %165 : vector<8x32xf32>
    %168 = arith.divf %166, %167 : vector<8x32xf32>
    %169 = vector.extract_strided_slice %156 {offsets = [0, 64], sizes = [8, 32], strides = [1, 1]} : vector<8x128xf32> to vector<8x32xf32>
    %170 = math.tanh %169 : vector<8x32xf32>
    %171 = vector.extract_strided_slice %156 {offsets = [0, 96], sizes = [8, 32], strides = [1, 1]} : vector<8x128xf32> to vector<8x32xf32>
    %172 = arith.negf %171 : vector<8x32xf32>
    %173 = math.exp %172 : vector<8x32xf32>
    %cst_40 = arith.constant 1.000000e+00 : f32
    %174 = vector.broadcast %cst_40 : f32 to vector<8x32xf32>
    %175 = arith.addf %174, %173 : vector<8x32xf32>
    %176 = arith.divf %174, %175 : vector<8x32xf32>
    %177 = arith.mulf %168, %150 : vector<8x32xf32>
    %178 = arith.mulf %162, %170 : vector<8x32xf32>
    %179 = arith.addf %177, %178 : vector<8x32xf32>
    %180 = math.tanh %179 : vector<8x32xf32>
    %181 = arith.mulf %176, %180 : vector<8x32xf32>
    %c40 = arith.constant 40 : index
    %c0_41 = arith.constant 0 : index
    %182 = vector.load %arg12[%c40, %c0_41] : memref<64x32xf32, #tpu.memory_space<vmem>>, vector<8x32xf32>
    tpu.vector_store %arg12[%c40, %c0_41], %181 {strides = array<i32>} : memref<64x32xf32, #tpu.memory_space<vmem>>, vector<8x32xf32>,
    %183 = vector.extract_strided_slice %5 {offsets = [48, 0], sizes = [8, 128], strides = [1, 1]} : vector<64x128xf32> to vector<8x128xf32>
    %cst_42 = arith.constant dense<0.000000e+00> : vector<8x128xf32>
    %184 = tpu.matmul %181, %6, %cst_42 {dimension_numbers = #tpu.dot_dimension_numbers<[1], [0], [0], [1], [0, 0, 1, 1], [], []>} : vector<8x32xf32>, vector<32x128xf32>, vector<8x128xf32> -> vector<8x128xf32>
    %185 = arith.addf %183, %184 : vector<8x128xf32>
    %186 = vector.extract_strided_slice %185 {offsets = [0, 0], sizes = [8, 32], strides = [1, 1]} : vector<8x128xf32> to vector<8x32xf32>
    %187 = arith.negf %186 : vector<8x32xf32>
    %188 = math.exp %187 : vector<8x32xf32>
    %cst_43 = arith.constant 1.000000e+00 : f32
    %189 = vector.broadcast %cst_43 : f32 to vector<8x32xf32>
    %190 = arith.addf %189, %188 : vector<8x32xf32>
    %191 = arith.divf %189, %190 : vector<8x32xf32>
    %192 = vector.extract_strided_slice %185 {offsets = [0, 32], sizes = [8, 32], strides = [1, 1]} : vector<8x128xf32> to vector<8x32xf32>
    %193 = arith.negf %192 : vector<8x32xf32>
    %194 = math.exp %193 : vector<8x32xf32>
    %cst_44 = arith.constant 1.000000e+00 : f32
    %195 = vector.broadcast %cst_44 : f32 to vector<8x32xf32>
    %196 = arith.addf %195, %194 : vector<8x32xf32>
    %197 = arith.divf %195, %196 : vector<8x32xf32>
    %198 = vector.extract_strided_slice %185 {offsets = [0, 64], sizes = [8, 32], strides = [1, 1]} : vector<8x128xf32> to vector<8x32xf32>
    %199 = math.tanh %198 : vector<8x32xf32>
    %200 = vector.extract_strided_slice %185 {offsets = [0, 96], sizes = [8, 32], strides = [1, 1]} : vector<8x128xf32> to vector<8x32xf32>
    %201 = arith.negf %200 : vector<8x32xf32>
    %202 = math.exp %201 : vector<8x32xf32>
    %cst_45 = arith.constant 1.000000e+00 : f32
    %203 = vector.broadcast %cst_45 : f32 to vector<8x32xf32>
    %204 = arith.addf %203, %202 : vector<8x32xf32>
    %205 = arith.divf %203, %204 : vector<8x32xf32>
    %206 = arith.mulf %197, %179 : vector<8x32xf32>
    %207 = arith.mulf %191, %199 : vector<8x32xf32>
    %208 = arith.addf %206, %207 : vector<8x32xf32>
    %209 = math.tanh %208 : vector<8x32xf32>
    %210 = arith.mulf %205, %209 : vector<8x32xf32>
    %c48 = arith.constant 48 : index
    %c0_46 = arith.constant 0 : index
    %211 = vector.load %arg12[%c48, %c0_46] : memref<64x32xf32, #tpu.memory_space<vmem>>, vector<8x32xf32>
    tpu.vector_store %arg12[%c48, %c0_46], %210 {strides = array<i32>} : memref<64x32xf32, #tpu.memory_space<vmem>>, vector<8x32xf32>,
    %212 = vector.extract_strided_slice %5 {offsets = [56, 0], sizes = [8, 128], strides = [1, 1]} : vector<64x128xf32> to vector<8x128xf32>
    %cst_47 = arith.constant dense<0.000000e+00> : vector<8x128xf32>
    %213 = tpu.matmul %210, %6, %cst_47 {dimension_numbers = #tpu.dot_dimension_numbers<[1], [0], [0], [1], [0, 0, 1, 1], [], []>} : vector<8x32xf32>, vector<32x128xf32>, vector<8x128xf32> -> vector<8x128xf32>
    %214 = arith.addf %212, %213 : vector<8x128xf32>
    %215 = vector.extract_strided_slice %214 {offsets = [0, 0], sizes = [8, 32], strides = [1, 1]} : vector<8x128xf32> to vector<8x32xf32>
    %216 = arith.negf %215 : vector<8x32xf32>
    %217 = math.exp %216 : vector<8x32xf32>
    %cst_48 = arith.constant 1.000000e+00 : f32
    %218 = vector.broadcast %cst_48 : f32 to vector<8x32xf32>
    %219 = arith.addf %218, %217 : vector<8x32xf32>
    %220 = arith.divf %218, %219 : vector<8x32xf32>
    %221 = vector.extract_strided_slice %214 {offsets = [0, 32], sizes = [8, 32], strides = [1, 1]} : vector<8x128xf32> to vector<8x32xf32>
    %222 = arith.negf %221 : vector<8x32xf32>
    %223 = math.exp %222 : vector<8x32xf32>
    %cst_49 = arith.constant 1.000000e+00 : f32
    %224 = vector.broadcast %cst_49 : f32 to vector<8x32xf32>
    %225 = arith.addf %224, %223 : vector<8x32xf32>
    %226 = arith.divf %224, %225 : vector<8x32xf32>
    %227 = vector.extract_strided_slice %214 {offsets = [0, 64], sizes = [8, 32], strides = [1, 1]} : vector<8x128xf32> to vector<8x32xf32>
    %228 = math.tanh %227 : vector<8x32xf32>
    %229 = vector.extract_strided_slice %214 {offsets = [0, 96], sizes = [8, 32], strides = [1, 1]} : vector<8x128xf32> to vector<8x32xf32>
    %230 = arith.negf %229 : vector<8x32xf32>
    %231 = math.exp %230 : vector<8x32xf32>
    %cst_50 = arith.constant 1.000000e+00 : f32
    %232 = vector.broadcast %cst_50 : f32 to vector<8x32xf32>
    %233 = arith.addf %232, %231 : vector<8x32xf32>
    %234 = arith.divf %232, %233 : vector<8x32xf32>
    %235 = arith.mulf %226, %208 : vector<8x32xf32>
    %236 = arith.mulf %220, %228 : vector<8x32xf32>
    %237 = arith.addf %235, %236 : vector<8x32xf32>
    %238 = math.tanh %237 : vector<8x32xf32>
    %239 = arith.mulf %234, %238 : vector<8x32xf32>
    %c56 = arith.constant 56 : index
    %c0_51 = arith.constant 0 : index
    %240 = vector.load %arg12[%c56, %c0_51] : memref<64x32xf32, #tpu.memory_space<vmem>>, vector<8x32xf32>
    tpu.vector_store %arg12[%c56, %c0_51], %239 {strides = array<i32>} : memref<64x32xf32, #tpu.memory_space<vmem>>, vector<8x32xf32>,
    %c0_52 = arith.constant 0 : index
    %c0_53 = arith.constant 0 : index
    %241 = vector.load %arg10[%c0_52, %c0_53] : memref<8x32xf32, #tpu.memory_space<vmem>>, vector<8x32xf32>
    tpu.vector_store %arg10[%c0_52, %c0_53], %239 {strides = array<i32>} : memref<8x32xf32, #tpu.memory_space<vmem>>, vector<8x32xf32>,
    %c0_54 = arith.constant 0 : index
    %c0_55 = arith.constant 0 : index
    %242 = vector.load %arg11[%c0_54, %c0_55] : memref<8x32xf32, #tpu.memory_space<vmem>>, vector<8x32xf32>
    tpu.vector_store %arg11[%c0_54, %c0_55], %237 {strides = array<i32>} : memref<8x32xf32, #tpu.memory_space<vmem>>, vector<8x32xf32>,
    %c0_56 = arith.constant 0 : index
    %c0_57 = arith.constant 0 : index
    %243 = vector.load %arg12[%c0_56, %c0_57] : memref<64x32xf32, #tpu.memory_space<vmem>>, vector<64x32xf32>
    %c0_58 = arith.constant 0 : index
    %c0_59 = arith.constant 0 : index
    %244 = vector.load %arg5[%c0_58, %c0_59] : memref<32x128xf32, #tpu.memory_space<vmem>>, vector<32x128xf32>
    %cst_60 = arith.constant dense<0.000000e+00> : vector<64x128xf32>
    %245 = tpu.matmul %243, %244, %cst_60 {dimension_numbers = #tpu.dot_dimension_numbers<[1], [0], [0], [1], [0, 0, 1, 1], [], []>} : vector<64x32xf32>, vector<32x128xf32>, vector<64x128xf32> -> vector<64x128xf32>
    %c0_61 = arith.constant 0 : index
    %c0_62 = arith.constant 0 : index
    %246 = vector.load %arg6[%c0_61, %c0_62] : memref<1x128xf32, #tpu.memory_space<vmem>>, vector<1x128xf32>
    %247 = vector.broadcast %246 : vector<1x128xf32> to vector<64x128xf32>
    %248 = arith.addf %245, %247 : vector<64x128xf32>
    %c0_63 = arith.constant 0 : index
    %c0_64 = arith.constant 0 : index
    %249 = vector.load %arg9[%c0_63, %c0_64] : memref<64x128xf32, #tpu.memory_space<vmem>>, vector<64x128xf32>
    tpu.vector_store %arg9[%c0_63, %c0_64], %248 {strides = array<i32>} : memref<64x128xf32, #tpu.memory_space<vmem>>, vector<64x128xf32>,
    return
  }
  func.func @transform_0(%arg0: i32) -> (i32, i32) {
    %c0_i32 = arith.constant 0 : i32
    %c0_i32_0 = arith.constant 0 : i32
    %c0_i32_1 = arith.constant 0 : i32
    return %c0_i32, %c0_i32_0 : i32, i32
  }
  func.func @transform_1(%arg0: i32) -> (i32, i32) {
    %c0_i32 = arith.constant 0 : i32
    %c0_i32_0 = arith.constant 0 : i32
    %c0_i32_1 = arith.constant 0 : i32
    return %c0_i32, %c0_i32_0 : i32, i32
  }
  func.func @transform_2(%arg0: i32) -> (i32, i32) {
    %c0_i32 = arith.constant 0 : i32
    %c0_i32_0 = arith.constant 0 : i32
    %c0_i32_1 = arith.constant 0 : i32
    return %c0_i32, %c0_i32_0 : i32, i32
  }
  func.func @transform_3(%arg0: i32) -> (i32, i32) {
    %c0_i32 = arith.constant 0 : i32
    %c0_i32_0 = arith.constant 0 : i32
    %c0_i32_1 = arith.constant 0 : i32
    return %c0_i32, %c0_i32_0 : i32, i32
  }
  func.func @transform_4(%arg0: i32) -> (i32, i32) {
    %c0_i32 = arith.constant 0 : i32
    %c0_i32_0 = arith.constant 0 : i32
    %c0_i32_1 = arith.constant 0 : i32
    return %c0_i32, %c0_i32_0 : i32, i32
  }
  func.func @transform_5(%arg0: i32) -> (i32, i32) {
    %c0_i32 = arith.constant 0 : i32
    %c0_i32_0 = arith.constant 0 : i32
    %c0_i32_1 = arith.constant 0 : i32
    return %c0_i32, %c0_i32_0 : i32, i32
  }
  func.func @transform_6(%arg0: i32) -> (i32, i32) {
    %c0_i32 = arith.constant 0 : i32
    %c0_i32_0 = arith.constant 0 : i32
    %c0_i32_1 = arith.constant 0 : i32
    return %c0_i32, %c0_i32_0 : i32, i32
  }
  func.func @transform_7(%arg0: i32) -> (i32, i32) {
    %c0_i32 = arith.constant 0 : i32
    %c0_i32_0 = arith.constant 0 : i32
    %c0_i32_1 = arith.constant 0 : i32
    return %c0_i32, %c0_i32_0 : i32, i32
  }
  func.func @transform_8(%arg0: i32) -> (i32, i32) {
    %c0_i32 = arith.constant 0 : i32
    %c0_i32_0 = arith.constant 0 : i32
    %c0_i32_1 = arith.constant 0 : i32
    return %c0_i32, %c0_i32_0 : i32, i32
  }
  func.func @transform_9(%arg0: i32) -> (i32, i32) {
    %c0_i32 = arith.constant 0 : i32
    %c0_i32_0 = arith.constant 0 : i32
    %c0_i32_1 = arith.constant 0 : i32
    return %c0_i32, %c0_i32_0 : i32, i32
  }
  func.func @transform_10(%arg0: i32) -> (i32, i32) {
    %c0_i32 = arith.constant 0 : i32
    %c0_i32_0 = arith.constant 0 : i32
    %c0_i32_1 = arith.constant 0 : i32
    return %c0_i32, %c0_i32_0 : i32, i32
  }
}

</mosaic_0001>

<bundles_post_ra>
// kernel: tpu_custom_call.1
= control target key start
LH: loop header
LB: loop body
LE: loop exit
PB: predicated region body
PF: predicated region fallthrough
CT: control target
= control target key end

     0   :  { %16 = vsyncpa [#allocation4], 0  ;;  %s1369_s0 = inlined_call_operand.vmem [shape: f32[64,50], index: 0, kind: input, shape index: {}]   ;;  %s1370_s1 = inlined_call_operand.vmem [shape: f32[50,128], index: 1, kind: input, shape index: {}]   ;;  %s1371_s2 = inlined_call_operand.vmem [shape: f32[32,128], index: 2, kind: input, shape index: {}]   ;;  %s1372_s3 = inlined_call_operand.vmem [shape: f32[1,128], index: 3, kind: input, shape index: {}]   ;;  %s1373_s4 = inlined_call_operand.vmem [shape: f32[32,128], index: 4, kind: input, shape index: {}]   ;;  %s1374_s5 = inlined_call_operand.vmem [shape: f32[1,128], index: 5, kind: input, shape index: {}]   ;;  %s1375_s6 = inlined_call_operand.hbm [shape: f32[8,32], index: 6, kind: input, shape index: {}]   ;;  %s1376_s7 = inlined_call_operand.hbm [shape: f32[8,32], index: 7, kind: input, shape index: {}]   ;;  %s1377_s8 = inlined_call_operand.hbm [shape: f32[64,128], index: 8, kind: output, shape index: {0}]   ;;  %s1378_s9 = inlined_call_operand.hbm [shape: f32[8,32], index: 9, kind: output, shape index: {1}]   ;;  %s1379_s10 = inlined_call_operand.hbm [shape: f32[8,32], index: 10, kind: output, shape index: {2}]  }
   0x1   :  { %17 = vsyncpa [#allocation7], 0 }
   0x2   :  { %18 = vsyncpa [#allocation5], 0 }
   0x3   :  { %19 = vsyncpa [#allocation10], 0  ;;  %s37_s15 = sshll.u32 %s1375_s6, 4  ;;  %s1077_s16 = smov [#allocation3]   ;;  %s38_s15 = int_to_ptr.hbm [resolvable:$true] %s37_s15 }
   0x4   :  { %s39_s17 = sshll.u32 %s1077_s16, 4  ;;  %s48_s20 = sshll.u32 %s1376_s7, 4  ;;  %s40_s17 = int_to_ptr.vmem [resolvable:$true] %s39_s17  ;;  %s49_s20 = int_to_ptr.hbm [resolvable:$true] %s48_s20 }
   0x5   :  { %42 = dma.hbm_to_vmem [thread:$0]  %s38_s15, 128, %s40_s17, [#allocation4]  }
   0x6   :  { %s1078_s21 = smov [#allocation6]  }
   0x7   :  { %s50_s22 = sshll.u32 %s1078_s21, 4  ;;  %s51_s22 = int_to_ptr.vmem [resolvable:$true] %s50_s22 }
   0x8   :  { %53 = dma.hbm_to_vmem [thread:$0]  %s49_s20, 128, %s51_s22, [#allocation7]  }
   0x9   :  { %1069 = dma.done.wait [#allocation4], 128  }
   0xa   :  { %1070 = vsyncadd [#allocation4], 4294967168 }
   0xb   :  { %1071 = dma.done.wait [#allocation7], 128  }
   0xc   :  { %1072 = vsyncadd [#allocation7], 4294967168  ;;  %vm106_vm0 = vcmask 1041408   ;;  %v76_v0 = vld [vmem:[%s1370_s1 + $0x30] sm:$0x3]  ;;  %v75_v1 = vld [vmem:[%s1370_s1 + $0x28] sm:$0xff] }
   0xd   :  { %829 = vmatpush.msk.msra.mxu0 %vm106_vm0, %v76_v0  ;;  %v1157_v2 = vld [vmem:[%s1371_s2 + $0x18] sm:$0xff]  ;;  %862 = vmatpush.msk.msra.mxu2 %vm106_vm0, %v76_v0  ;;  %v74_v3 = vld [vmem:[%s1370_s1 + $0x20] sm:$0xff]  ;;  %v1166_v4 = vld [vmem:[%s1371_s2 + $0x10] sm:$0xff]  ;;  %vm157_vm1 = vcmask 261120   ;;  %vm81_vm2 = vcmask 408576   ;;  %s1079_s24 = smov 64  }
   0xe   :  { %173 = vmatpush.msra.mxu1 %v1157_v2  ;;  %502 = vmatpush.msra.mxu3 %v1157_v2  ;;  %v1172_v5 = vld [vmem:[%s1371_s2 + $0x8] sm:$0xff]  ;;  %v73_v6 = vld [vmem:[%s1370_s1 + $0x18] sm:$0xff]  ;;  %v1182_v7 = vld [vmem:[%s1371_s2] sm:$0xff]  ;;  %s1080_s25 = smov 32   ;;  %s1082_s23 = smov [#allocation9]  }
   0xf   :  { %120 = vmatpush.msra.mxu0 %v75_v1  ;;  %863 = vmatpush.msra.mxu2 %v75_v1  ;;  %v72_v8 = vld [vmem:[%s1370_s1 + $0x10] sm:$0xff]  ;;  %v155_v9 = vld [vmem:[#allocation3] sm:$0xff]  ;;  %v71_v10 = vld [vmem:[%s1370_s1 + $0x8] sm:$0xff]  ;;  %s1083_s27 = smov [#allocation11]   ;;  %s809_s30 = sshll.u32 %s1379_s10, 4  ;;  %s810_s30 = int_to_ptr.hbm [resolvable:$true] %s809_s30 }
  0x10   :  { %174 = vmatpush.msra.mxu1 %v1166_v4  ;;  %503 = vmatpush.msra.mxu3 %v1166_v4  ;;  %v70_v11 = vld [vmem:[%s1370_s1] sm:$0xff]  ;;  %v156_v19 = vld [vmem:[#allocation6] sm:$0xff]  ;;  %v68_v40 = vld [vmem:[%s1369_s0 + $0x30] sm:$0xff]  ;;  %s807_s28 = sshll.u32 %s1083_s27, 4  ;;  %s1084_s11 = smov [#allocation8]   ;;  %s808_s28 = int_to_ptr.vmem [resolvable:$true] %s807_s28 }
  0x11   :  { %121 = vmatpush.msra.mxu0 %v74_v3  ;;  %864 = vmatpush.msra.mxu2 %v74_v3  ;;  %v62_v12 = vld [vmem:[%s1369_s0] sm:$0xff]  ;;  %v69_v41 = vld [vmem:[%s1369_s0 + $0x38] sm:$0xff]  ;;  %v63_v44 = vld [vmem:[%s1369_s0 + $0x8] sm:$0xff]  ;;  %s782_s12 = sshll.u32 %s1084_s11, 4  ;;  %s784_s15 = sshll.u32 %s1377_s8, 4  ;;  %s783_s12 = int_to_ptr.vmem [resolvable:$true] %s782_s12  ;;  %s785_s15 = int_to_ptr.hbm [resolvable:$true] %s784_s15 }
  0x12   :  { %175 = vmatpush.msra.mxu1 %v1172_v5  ;;  %504 = vmatpush.msra.mxu3 %v1172_v5  ;;  %v1217_v13 = vld [vmem:[%s1372_s3] ss:$0 sm:$0xff]  ;;  %s796_s3 = sshll.u32 %s1082_s23, 4  ;;  %s1086_s16 = smov 8   ;;  %s797_s3 = int_to_ptr.vmem [resolvable:$true] %s796_s3 }
  0x13   :  { %122 = vmatpush.msra.mxu0 %v73_v6  ;;  %865 = vmatpush.msra.mxu2 %v73_v6 }
  0x14   :  { %176 = vmatpush.msra.mxu1 %v1182_v7  ;;  %505 = vmatpush.msra.mxu3 %v1182_v7 }
  0x15   :  { %123 = vmatpush.msra.mxu0 %v72_v8  ;;  %838 = vmatmul.msk.f32.vlgmr.msra.gmra.mxu1 %vm157_vm1, %v155_v9 }
  0x16   :  { %866 = vmatpush.msra.mxu2 %v72_v8  ;;  %372 = vmatpush.msrb.mxu1 %v1157_v2 }
  0x17   :  { %124 = vmatpush.msra.mxu0 %v71_v10 }
  0x18   :  { %867 = vmatpush.msra.mxu2 %v71_v10  ;;  %373 = vmatpush.msrb.mxu1 %v1166_v4 }
  0x19   :  { %125 = vmatpush.msra.mxu0 %v70_v11 }
  0x1a   :  { %830 = vmatmul.msk.f32.vlgmr.msra.gmra.mxu0 %vm81_vm2, %v62_v12  ;;  %868 = vmatpush.msra.mxu2 %v70_v11 }
  0x1b   :  { %374 = vmatpush.msrb.mxu1 %v1172_v5  ;;  %836 = vmatmul.msk.f32.vlgmr.msra.gmra.mxu2 %vm81_vm2, %v68_v40 }
  0x1c   :  { %242 = vmatpush.msrb.mxu2 %v1157_v2 }
  0x1d   :  { %375 = vmatpush.msrb.mxu1 %v1182_v7 }
  0x1e   :  { %243 = vmatpush.msrb.mxu2 %v1166_v4 }
  0x1f   :  { %567 = vmatpush.msra.mxu1 %v1157_v2 }
  0x20   :  { %244 = vmatpush.msrb.mxu2 %v1172_v5 }
  0x21   :  { %568 = vmatpush.msra.mxu1 %v1166_v4 }
  0x22   :  { %245 = vmatpush.msrb.mxu2 %v1182_v7  ;;  %831 = vmatmul.msk.f32.gmra.mxu0 %vm81_vm2, %v63_v44 }
  0x23   :  { %569 = vmatpush.msra.mxu1 %v1172_v5  ;;  %837 = vmatmul.msk.f32.gmra.mxu2 %vm81_vm2, %v69_v41 }
  0x24   :  { %307 = vmatpush.msra.mxu2 %v1157_v2 }
  0x25   :  { %570 = vmatpush.msra.mxu1 %v1182_v7 }
  0x26   :  { %308 = vmatpush.msra.mxu2 %v1166_v4 }
  0x28   :  { %309 = vmatpush.msra.mxu2 %v1172_v5 }
  0x2a   :  { %310 = vmatpush.msra.mxu2 %v1182_v7 }
  0x92   :  { %v178_v15 = vpop.f32.mrf.mxu1 }
  0x97   :  { %v127_v14 = vpop.f32.mrf.mxu0 }
  0x98   :  { %v128_v16 = vadd.f32 %v1217_v13, %v127_v14 }
  0x9a   :  { %v181_v17 = vadd.f32 %v178_v15, %v128_v16  ;;  %v64_v15 = vld [vmem:[%s1369_s0 + $0x10] sm:$0xff] }
  0x9b   :  { %832 = vmatmul.msk.f32.gmra.mxu0 %vm81_vm2, %v64_v15 }
  0x9c   :  { %885 = vtanh.f32 %v181_v17  ;;  %v839_v20 = vmul.f32 -1.442695, %v181_v17 }
  0x9e   :  { %887 = vpow2.f32 %v839_v20  ;;  %v1247_v46 = vpop.f32.mrf.mxu2 }
  0x9f   :  { %v130_v48 = vpop.f32.mrf.mxu0 }
  0xa0   :  { %v131_v49 = vadd.f32 %v1217_v13, %v130_v48 }
  0xa2   :  { %v886_v18 = vpop.eup %885 }
  0xa3   :  { %208 = vrot.lane.b32.xlu0 %v886_v18, %s1079_s24 }
  0xa4   :  { %v888_v21 = vpop.eup %887 }
  0xa5   :  { %v185_v22 = vadd.f32 1.0, %v888_v21 }
  0xa6   :  { %v1249_v47 = vpop.f32.mrf.mxu2 }
  0xa7   :  { %889 = vrcp.f32 %v185_v22  ;;  %v197_v28 = vand.u32 2147483648, %v185_v22  ;;  %vm191_vm4 = vweird.f32 %v185_v22  ;;  %v195_v29 = vand.u32 2147483647, %v185_v22 }
  0xa9   :  { %v198_v31 = vor.u32 1.1754944e-38, %v197_v28  ;;  %vm196_vm6 = vcmp.eq.f32.partialorder %v195_v29, 8.507059e+37 }
  0xab   :  { %203 = vrot.lane.b32.xlu0 %v156_v19, %s1080_s25 }
  0xad   :  { %v890_v23 = vpop.eup %889 }
  0xae   :  { %v187_v24 = vmul.f32 %v890_v23, %v185_v22  ;;  %vm192_vm3 = vweird.f32 %v890_v23 }
  0xaf   :  { %vm193_vm5 = vmor %vm191_vm4, %vm192_vm3 }
  0xb0   :  { %v188_v25 = vsub.f32 1.0, %v187_v24 }
  0xb2   :  { %v189_v26 = vmul.f32 %v890_v23, %v188_v25 }
  0xb4   :  { %v190_v27 = vadd.f32 %v890_v23, %v189_v26 }
  0xb6   :  { %v194_v30 = vsel %vm193_vm5, %v890_v23, %v190_v27 }
  0xb7   :  { %v199_v33 = vsel %vm196_vm6, %v198_v31, %v194_v30 }
 0x115   :  { %v209_v32 = vpop.permute.xlu0 %208 }
 0x116   :  { %v211_v34 = vmul.f32 %v209_v32, %v199_v33 }
 0x118   :  { %213 = vrot.lane.b32.xlu1 %v211_v34, %s1080_s25  ;;  %v133_v17 = vpop.f32.mrf.mxu0 }
 0x119   :  { %v134_v18 = vadd.f32 %v1217_v13, %v133_v17 }
 0x11d   :  { %v204_v35 = vpop.permute.xlu0 %203 }
 0x11e   :  { %v206_v36 = vmul.f32 %v204_v35, %v199_v33 }
 0x18a   :  { %v214_v37 = vpop.permute.xlu1 %213 }
 0x18b   :  { %v216_v38 = vadd.f32 %v214_v37, %v206_v36  ;;  %v65_v37 = vld [vmem:[%s1369_s0 + $0x18] sm:$0xff] }
 0x18c   :  { %833 = vmatmul.msk.f32.gmra.mxu0 %vm81_vm2, %v65_v37  ;;  %v698_v37 = vld [vmem:[%s1373_s4 + $0x8] sm:$0xff] }
 0x18d   :  { %891 = vtanh.f32 %v216_v38 }
 0x193   :  { %v892_v39 = vpop.eup %891 }
 0x194   :  { %219 = vrot.lane.b32.xlu1 %v892_v39, %s1079_s24 }
 0x206   :  { %v220_v42 = vpop.permute.xlu1 %219 }
 0x207   :  { %v222_v43 = vmul.f32 %v220_v42, %v199_v33 }
 0x209   :  { %224 = vrot.lane.b32.xlu2 %v222_v43, %s1080_s25  ;;  %v136_v41 = vpop.f32.mrf.mxu0 }
 0x20a   :  { %v137_v42 = vadd.f32 %v1217_v13, %v136_v41 }
 0x263   :  { %v225_v45 = vpop.permute.xlu2 %224 }
 0x264   :  { %227 = vst.msk [vmem:[#allocation2] sm:$0xff] %vm157_vm1, %v225_v45  ;;  %840 = vmatmul.msk.f32.vlgmr.msrb.gmra.mxu2 %vm157_vm1, %v225_v45 }
 0x265   :  { %437 = vmatpush.msrb.mxu2 %v1157_v2 }
 0x267   :  { %438 = vmatpush.msrb.mxu2 %v1166_v4 }
 0x269   :  { %439 = vmatpush.msrb.mxu2 %v1172_v5 }
 0x26b   :  { %440 = vmatpush.msrb.mxu2 %v1182_v7 }
 0x2e7   :  { %v247_v50 = vpop.f32.mrf.mxu2 }
 0x2e8   :  { %v250_v51 = vadd.f32 %v247_v50, %v131_v49 }
 0x2ea   :  { %893 = vtanh.f32 %v250_v51  ;;  %v841_v53 = vmul.f32 -1.442695, %v250_v51 }
 0x2ec   :  { %895 = vpow2.f32 %v841_v53 }
 0x2f0   :  { %v894_v52 = vpop.eup %893 }
 0x2f1   :  { %273 = vrot.lane.b32.xlu2 %v894_v52, %s1079_s24 }
 0x2f2   :  { %v896_v54 = vpop.eup %895 }
 0x2f3   :  { %v254_v55 = vadd.f32 1.0, %v896_v54 }
 0x2f5   :  { %897 = vrcp.f32 %v254_v55  ;;  %v266_v61 = vand.u32 2147483648, %v254_v55  ;;  %vm260_vm8 = vweird.f32 %v254_v55  ;;  %v264_v62 = vand.u32 2147483647, %v254_v55 }
 0x2f7   :  { %v267_v0 = vor.u32 1.1754944e-38, %v266_v61  ;;  %vm265_vm10 = vcmp.eq.f32.partialorder %v264_v62, 8.507059e+37 }
 0x2fb   :  { %v898_v56 = vpop.eup %897 }
 0x2fc   :  { %v256_v57 = vmul.f32 %v898_v56, %v254_v55  ;;  %vm261_vm7 = vweird.f32 %v898_v56 }
 0x2fd   :  { %vm262_vm9 = vmor %vm260_vm8, %vm261_vm7 }
 0x2fe   :  { %v257_v58 = vsub.f32 1.0, %v256_v57 }
 0x300   :  { %v258_v59 = vmul.f32 %v898_v56, %v257_v58 }
 0x302   :  { %v259_v60 = vadd.f32 %v898_v56, %v258_v59 }
 0x304   :  { %v263_v63 = vsel %vm262_vm9, %v898_v56, %v259_v60 }
 0x305   :  { %v268_v3 = vsel %vm265_vm10, %v267_v0, %v263_v63 }
 0x306   :  { %v271_v8 = vmul.f32 %v268_v3, %v216_v38 }
 0x34b   :  { %v274_v1 = vpop.permute.xlu2 %273 }
 0x34c   :  { %v276_v6 = vmul.f32 %v274_v1, %v268_v3 }
 0x34e   :  { %278 = vrot.lane.b32.xlu0 %v276_v6, %s1080_s25 }
 0x3c0   :  { %v279_v9 = vpop.permute.xlu0 %278 }
 0x3c1   :  { %v281_v10 = vadd.f32 %v279_v9, %v271_v8  ;;  %v66_v9 = vld [vmem:[%s1369_s0 + $0x20] sm:$0xff] }
 0x3c2   :  { %834 = vmatmul.msk.f32.gmra.mxu0 %vm81_vm2, %v66_v9 }
 0x3c3   :  { %899 = vtanh.f32 %v281_v10 }
 0x3c9   :  { %v900_v11 = vpop.eup %899 }
 0x3ca   :  { %284 = vrot.lane.b32.xlu1 %v900_v11, %s1079_s24 }
 0x43c   :  { %v285_v12 = vpop.permute.xlu1 %284 }
 0x43d   :  { %v287_v14 = vmul.f32 %v285_v12, %v268_v3 }
 0x43f   :  { %289 = vrot.lane.b32.xlu2 %v287_v14, %s1080_s25  ;;  %v139_v11 = vpop.f32.mrf.mxu0 }
 0x440   :  { %v140_v12 = vadd.f32 %v1217_v13, %v139_v11 }
 0x499   :  { %v290_v16 = vpop.permute.xlu2 %289 }
 0x49a   :  { %292 = vst.msk [vmem:[#allocation2 + $0x8] sm:$0xff] %vm157_vm1, %v290_v16  ;;  %842 = vmatmul.msk.f32.vlgmr.msra.gmra.mxu2 %vm157_vm1, %v290_v16 }
 0x49b   :  { %632 = vmatpush.msra.mxu2 %v1157_v2 }
 0x49d   :  { %633 = vmatpush.msra.mxu2 %v1166_v4 }
 0x49f   :  { %634 = vmatpush.msra.mxu2 %v1172_v5 }
 0x4a1   :  { %635 = vmatpush.msra.mxu2 %v1182_v7 }
 0x51d   :  { %v312_v19 = vpop.f32.mrf.mxu2 }
 0x51e   :  { %v315_v20 = vadd.f32 %v312_v19, %v134_v18 }
 0x520   :  { %901 = vtanh.f32 %v315_v20  ;;  %v843_v22 = vmul.f32 -1.442695, %v315_v20 }
 0x522   :  { %903 = vpow2.f32 %v843_v22 }
 0x526   :  { %v902_v21 = vpop.eup %901 }
 0x527   :  { %338 = vrot.lane.b32.xlu0 %v902_v21, %s1079_s24 }
 0x528   :  { %v904_v23 = vpop.eup %903 }
 0x529   :  { %v319_v24 = vadd.f32 1.0, %v904_v23 }
 0x52b   :  { %905 = vrcp.f32 %v319_v24  ;;  %v331_v7 = vand.u32 2147483648, %v319_v24  ;;  %vm325_vm12 = vweird.f32 %v319_v24  ;;  %v329_v27 = vand.u32 2147483647, %v319_v24 }
 0x52d   :  { %v332_v29 = vor.u32 1.1754944e-38, %v331_v7  ;;  %vm330_vm14 = vcmp.eq.f32.partialorder %v329_v27, 8.507059e+37 }
 0x531   :  { %v906_v2 = vpop.eup %905 }
 0x532   :  { %v321_v4 = vmul.f32 %v906_v2, %v319_v24  ;;  %vm326_vm11 = vweird.f32 %v906_v2 }
 0x533   :  { %vm327_vm13 = vmor %vm325_vm12, %vm326_vm11 }
 0x534   :  { %v322_v25 = vsub.f32 1.0, %v321_v4 }
 0x536   :  { %v323_v5 = vmul.f32 %v906_v2, %v322_v25 }
 0x538   :  { %v324_v26 = vadd.f32 %v906_v2, %v323_v5 }
 0x53a   :  { %v328_v28 = vsel %vm327_vm13, %v906_v2, %v324_v26 }
 0x53b   :  { %v333_v31 = vsel %vm330_vm14, %v332_v29, %v328_v28 }
 0x53c   :  { %v336_v33 = vmul.f32 %v333_v31, %v281_v10 }
 0x599   :  { %v339_v30 = vpop.permute.xlu0 %338 }
 0x59a   :  { %v341_v32 = vmul.f32 %v339_v30, %v333_v31 }
 0x59c   :  { %343 = vrot.lane.b32.xlu1 %v341_v32, %s1080_s25 }
 0x60e   :  { %v344_v34 = vpop.permute.xlu1 %343 }
 0x60f   :  { %v346_v35 = vadd.f32 %v344_v34, %v336_v33  ;;  %v700_v34 = vld [vmem:[%s1373_s4 + $0x18] sm:$0xff] }
 0x610   :  { %869 = vmatpush.msrb.mxu3 %v700_v34 }
 0x611   :  { %907 = vtanh.f32 %v346_v35 }
 0x617   :  { %v908_v36 = vpop.eup %907 }
 0x618   :  { %349 = vrot.lane.b32.xlu2 %v908_v36, %s1079_s24  ;;  %v67_v36 = vld [vmem:[%s1369_s0 + $0x28] sm:$0xff] }
 0x619   :  { %835 = vmatmul.msk.f32.gmra.mxu0 %vm81_vm2, %v67_v36 }
 0x672   :  { %v350_v38 = vpop.permute.xlu2 %349 }
 0x673   :  { %v352_v39 = vmul.f32 %v350_v38, %v333_v31  ;;  %v697_v38 = vld [vmem:[%s1373_s4] sm:$0xff] }
 0x675   :  { %354 = vrot.lane.b32.xlu0 %v352_v39, %s1080_s25 }
 0x6e7   :  { %v355_v40 = vpop.permute.xlu0 %354 }
 0x6e8   :  { %357 = vst.msk [vmem:[#allocation2 + $0x10] sm:$0xff] %vm157_vm1, %v355_v40  ;;  %844 = vmatmul.msk.f32.vlgmr.msrb.gmra.mxu1 %vm157_vm1, %v355_v40 }
 0x6e9   :  { %741 = vmatpush.msrb.mxu1 %v700_v34 }
 0x765   :  { %v377_v43 = vpop.f32.mrf.mxu1 }
 0x766   :  { %v380_v44 = vadd.f32 %v377_v43, %v137_v42  ;;  %v142_v42 = vpop.f32.mrf.mxu0 }
 0x767   :  { %v143_v43 = vadd.f32 %v1217_v13, %v142_v42 }
 0x768   :  { %909 = vtanh.f32 %v380_v44  ;;  %v845_v48 = vmul.f32 -1.442695, %v380_v44 }
 0x76a   :  { %911 = vpow2.f32 %v845_v48  ;;  %v1320_v48 = vld [vmem:[%s1374_s5] ss:$0 sm:$0xff]  ;;  %s1081_s5 = smov 96  }
 0x76e   :  { %v910_v45 = vpop.eup %909 }
 0x76f   :  { %403 = vrot.lane.b32.xlu1 %v910_v45, %s1079_s24 }
 0x770   :  { %v912_v49 = vpop.eup %911 }
 0x771   :  { %v384_v50 = vadd.f32 1.0, %v912_v49 }
 0x773   :  { %913 = vrcp.f32 %v384_v50  ;;  %v396_v56 = vand.u32 2147483648, %v384_v50  ;;  %vm390_vm0 = vweird.f32 %v384_v50  ;;  %v394_v57 = vand.u32 2147483647, %v384_v50 }
 0x775   :  { %v397_v59 = vor.u32 1.1754944e-38, %v396_v56  ;;  %vm395_vm4 = vcmp.eq.f32.partialorder %v394_v57, 8.507059e+37 }
 0x779   :  { %v914_v51 = vpop.eup %913 }
 0x77a   :  { %v386_v52 = vmul.f32 %v914_v51, %v384_v50  ;;  %vm391_vm15 = vweird.f32 %v914_v51 }
 0x77b   :  { %vm392_vm3 = vmor %vm390_vm0, %vm391_vm15 }
 0x77c   :  { %v387_v53 = vsub.f32 1.0, %v386_v52 }
 0x77e   :  { %v388_v54 = vmul.f32 %v914_v51, %v387_v53 }
 0x780   :  { %v389_v55 = vadd.f32 %v914_v51, %v388_v54 }
 0x782   :  { %v393_v58 = vsel %vm392_vm3, %v914_v51, %v389_v55 }
 0x783   :  { %v398_v61 = vsel %vm395_vm4, %v397_v59, %v393_v58 }
 0x784   :  { %v401_v63 = vmul.f32 %v398_v61, %v346_v35  ;;  %v699_v35 = vld [vmem:[%s1373_s4 + $0x10] sm:$0xff] }
 0x785   :  { %870 = vmatpush.msrb.mxu3 %v699_v35  ;;  %742 = vmatpush.msrb.mxu1 %v699_v35 }
 0x787   :  { %871 = vmatpush.msrb.mxu3 %v698_v37  ;;  %743 = vmatpush.msrb.mxu1 %v698_v37 }
 0x789   :  { %872 = vmatpush.msrb.mxu3 %v697_v38  ;;  %744 = vmatpush.msrb.mxu1 %v697_v38 }
 0x7e1   :  { %v404_v60 = vpop.permute.xlu1 %403 }
 0x7e2   :  { %v406_v62 = vmul.f32 %v404_v60, %v398_v61 }
 0x7e4   :  { %408 = vrot.lane.b32.xlu2 %v406_v62, %s1080_s25 }
 0x83e   :  { %v409_v0 = vpop.permute.xlu2 %408 }
 0x83f   :  { %v411_v1 = vadd.f32 %v409_v0, %v401_v63 }
 0x841   :  { %915 = vtanh.f32 %v411_v1 }
 0x847   :  { %v916_v3 = vpop.eup %915 }
 0x848   :  { %414 = vrot.lane.b32.xlu0 %v916_v3, %s1079_s24 }
 0x8ba   :  { %v415_v6 = vpop.permute.xlu0 %414 }
 0x8bb   :  { %v417_v8 = vmul.f32 %v415_v6, %v398_v61 }
 0x8bd   :  { %419 = vrot.lane.b32.xlu1 %v417_v8, %s1080_s25 }
 0x92f   :  { %v420_v10 = vpop.permute.xlu1 %419 }
 0x930   :  { %422 = vst.msk [vmem:[#allocation2 + $0x18] sm:$0xff] %vm157_vm1, %v420_v10  ;;  %846 = vmatmul.msk.f32.vlgmr.msrb.gmra.mxu2 %vm157_vm1, %v420_v10 }
 0x937   :  { %v692_v40 = vld [vmem:[#allocation2 + $0x18] sm:$0xff] }
 0x9b3   :  { %v442_v14 = vpop.f32.mrf.mxu2 }
 0x9b4   :  { %v445_v15 = vadd.f32 %v442_v14, %v140_v12 }
 0x9b6   :  { %917 = vtanh.f32 %v445_v15  ;;  %v847_v17 = vmul.f32 -1.442695, %v445_v15 }
 0x9b8   :  { %919 = vpow2.f32 %v847_v17  ;;  %v689_v17 = vld [vmem:[#allocation2] sm:$0xff] }
 0x9bc   :  { %v918_v16 = vpop.eup %917 }
 0x9bd   :  { %468 = vrot.lane.b32.xlu2 %v918_v16, %s1079_s24 }
 0x9be   :  { %v920_v18 = vpop.eup %919 }
 0x9bf   :  { %v449_v19 = vadd.f32 1.0, %v920_v18 }
 0x9c1   :  { %921 = vrcp.f32 %v449_v19  ;;  %v461_v2 = vand.u32 2147483648, %v449_v19  ;;  %vm455_vm6 = vweird.f32 %v449_v19  ;;  %v459_v4 = vand.u32 2147483647, %v449_v19 }
 0x9c3   :  { %v462_v5 = vor.u32 1.1754944e-38, %v461_v2  ;;  %vm460_vm8 = vcmp.eq.f32.partialorder %v459_v4, 8.507059e+37 }
 0x9c7   :  { %v922_v20 = vpop.eup %921 }
 0x9c8   :  { %v451_v21 = vmul.f32 %v922_v20, %v449_v19  ;;  %vm456_vm5 = vweird.f32 %v922_v20  ;;  %v690_v19 = vld [vmem:[#allocation2 + $0x8] sm:$0xff] }
 0x9c9   :  { %vm457_vm7 = vmor %vm455_vm6, %vm456_vm5 }
 0x9ca   :  { %v452_v22 = vsub.f32 1.0, %v451_v21  ;;  %v146_v21 = vadd.f32 %v1217_v13, %v1247_v46 }
 0x9cc   :  { %v453_v23 = vmul.f32 %v922_v20, %v452_v22 }
 0x9ce   :  { %v454_v24 = vadd.f32 %v922_v20, %v453_v23 }
 0x9d0   :  { %v458_v25 = vsel %vm457_vm7, %v922_v20, %v454_v24  ;;  %v691_v20 = vld [vmem:[#allocation2 + $0x10] sm:$0xff] }
 0x9d1   :  { %v463_v7 = vsel %vm460_vm8, %v462_v5, %v458_v25 }
 0x9d2   :  { %v466_v28 = vmul.f32 %v463_v7, %v411_v1 }
 0xa17   :  { %v469_v26 = vpop.permute.xlu2 %468 }
 0xa18   :  { %v471_v27 = vmul.f32 %v469_v26, %v463_v7 }
 0xa1a   :  { %473 = vrot.lane.b32.xlu0 %v471_v27, %s1080_s25 }
 0xa8c   :  { %v474_v29 = vpop.permute.xlu0 %473 }
 0xa8d   :  { %v1291_v30 = vadd.f32 %v474_v29, %v466_v28 }
 0xa8f   :  { %923 = vtanh.f32 %v1291_v30 }
 0xa95   :  { %v924_v31 = vpop.eup %923 }
 0xa96   :  { %479 = vrot.lane.b32.xlu1 %v924_v31, %s1079_s24 }
 0xb08   :  { %v480_v32 = vpop.permute.xlu1 %479 }
 0xb09   :  { %v482_v33 = vmul.f32 %v480_v32, %v463_v7 }
 0xb0b   :  { %484 = vrot.lane.b32.xlu2 %v482_v33, %s1080_s25 }
 0xb65   :  { %v485_v39 = vpop.permute.xlu2 %484 }
 0xb66   :  { %487 = vst.msk [vmem:[#allocation2 + $0x20] sm:$0xff] %vm157_vm1, %v485_v39  ;;  %848 = vmatmul.msk.f32.vlgmr.msra.gmra.mxu3 %vm157_vm1, %v485_v39 }
 0xb6d   :  { %v693_v41 = vld [vmem:[#allocation2 + $0x20] sm:$0xff] }
 0xb6e   :  { %857 = vmatmul.msk.f32.vlgmr.msrb.gmra.mxu3 %vm157_vm1, %v692_v40 }
 0xb76   :  { %858 = vmatmul.msk.f32.gmra.mxu3 %vm157_vm1, %v693_v41 }
 0xbe9   :  { %v507_v44 = vpop.f32.mrf.mxu3 }
 0xbea   :  { %v510_v45 = vadd.f32 %v507_v44, %v143_v43 }
 0xbec   :  { %925 = vtanh.f32 %v510_v45  ;;  %v849_v54 = vmul.f32 -1.442695, %v510_v45 }
 0xbee   :  { %927 = vpow2.f32 %v849_v54  ;;  %v149_v54 = vadd.f32 %v1217_v13, %v1249_v47 }
 0xbf1   :  { %v755_v49 = vpop.f32.mrf.mxu3 }
 0xbf2   :  { %v926_v50 = vpop.eup %925  ;;  %v756_v51 = vadd.f32 %v1320_v48, %v755_v49 }
 0xbf3   :  { %533 = vrot.lane.b32.xlu0 %v926_v50, %s1079_s24 }
 0xbf4   :  { %773 = vst [vmem:[#allocation8 + $0x18] sm:$0xff] %v756_v51  ;;  %v928_v55 = vpop.eup %927 }
 0xbf5   :  { %v514_v56 = vadd.f32 1.0, %v928_v55 }
 0xbf7   :  { %929 = vrcp.f32 %v514_v56  ;;  %v526_v62 = vand.u32 2147483648, %v514_v56  ;;  %vm520_vm9 = vweird.f32 %v514_v56  ;;  %v524_v63 = vand.u32 2147483647, %v514_v56 }
 0xbf9   :  { %v758_v52 = vpop.f32.mrf.mxu3  ;;  %v527_v1 = vor.u32 1.1754944e-38, %v526_v62  ;;  %vm525_vm11 = vcmp.eq.f32.partialorder %v524_v63, 8.507059e+37 }
 0xbfa   :  { %v759_v53 = vadd.f32 %v1320_v48, %v758_v52 }
 0xbfc   :  { %774 = vst [vmem:[#allocation8 + $0x20] sm:$0xff] %v759_v53 }
 0xbfd   :  { %v930_v57 = vpop.eup %929 }
 0xbfe   :  { %v516_v58 = vmul.f32 %v930_v57, %v514_v56  ;;  %vm521_vm2 = vweird.f32 %v930_v57 }
 0xbff   :  { %vm522_vm10 = vmor %vm520_vm9, %vm521_vm2 }
 0xc00   :  { %v517_v59 = vsub.f32 1.0, %v516_v58 }
 0xc02   :  { %v518_v60 = vmul.f32 %v930_v57, %v517_v59 }
 0xc04   :  { %v519_v61 = vadd.f32 %v930_v57, %v518_v60 }
 0xc06   :  { %v523_v0 = vsel %vm522_vm10, %v930_v57, %v519_v61 }
 0xc07   :  { %v528_v6 = vsel %vm525_vm11, %v527_v1, %v523_v0 }
 0xc08   :  { %v531_v9 = vmul.f32 %v528_v6, %v1291_v30 }
 0xc65   :  { %v534_v3 = vpop.permute.xlu0 %533 }
 0xc66   :  { %v536_v8 = vmul.f32 %v534_v3, %v528_v6 }
 0xc68   :  { %538 = vrot.lane.b32.xlu1 %v536_v8, %s1080_s25 }
 0xcda   :  { %v539_v10 = vpop.permute.xlu1 %538 }
 0xcdb   :  { %v541_v11 = vadd.f32 %v539_v10, %v531_v9 }
 0xcdd   :  { %931 = vtanh.f32 %v541_v11 }
 0xce3   :  { %v932_v12 = vpop.eup %931 }
 0xce4   :  { %544 = vrot.lane.b32.xlu2 %v932_v12, %s1079_s24 }
 0xd3e   :  { %v545_v14 = vpop.permute.xlu2 %544 }
 0xd3f   :  { %v547_v15 = vmul.f32 %v545_v14, %v528_v6 }
 0xd41   :  { %549 = vrot.lane.b32.xlu0 %v547_v15, %s1080_s25 }
 0xdb3   :  { %v550_v16 = vpop.permute.xlu0 %549 }
 0xdb4   :  { %552 = vst.msk [vmem:[#allocation2 + $0x28] sm:$0xff] %vm157_vm1, %v550_v16  ;;  %850 = vmatmul.msk.f32.vlgmr.msra.gmra.mxu1 %vm157_vm1, %v550_v16 }
 0xdbb   :  { %v694_v18 = vld [vmem:[#allocation2 + $0x28] sm:$0xff] }
 0xdbc   :  { %854 = vmatmul.msk.f32.vlgmr.msrb.gmra.mxu1 %vm157_vm1, %v689_v17  ;;  %859 = vmatmul.msk.f32.gmra.mxu3 %vm157_vm1, %v694_v18 }
 0xdc4   :  { %855 = vmatmul.msk.f32.gmra.mxu1 %vm157_vm1, %v690_v19 }
 0xdcc   :  { %856 = vmatmul.msk.f32.gmra.mxu1 %vm157_vm1, %v691_v20 }
 0xe31   :  { %v572_v22 = vpop.f32.mrf.mxu1 }
 0xe32   :  { %v575_v23 = vadd.f32 %v572_v22, %v146_v21 }
 0xe34   :  { %933 = vtanh.f32 %v575_v23  ;;  %v851_v28 = vmul.f32 -1.442695, %v575_v23 }
 0xe36   :  { %935 = vpow2.f32 %v851_v28 }
 0xe39   :  { %v746_v24 = vpop.f32.mrf.mxu1 }
 0xe3a   :  { %v934_v2 = vpop.eup %933  ;;  %v747_v4 = vadd.f32 %v1320_v48, %v746_v24 }
 0xe3b   :  { %598 = vrot.lane.b32.xlu1 %v934_v2, %s1079_s24 }
 0xe3c   :  { %770 = vst [vmem:[#allocation8] sm:$0xff] %v747_v4  ;;  %v936_v29 = vpop.eup %935 }
 0xe3d   :  { %v579_v30 = vadd.f32 1.0, %v936_v29 }
 0xe3f   :  { %v761_v25 = vpop.f32.mrf.mxu3  ;;  %937 = vrcp.f32 %v579_v30  ;;  %v591_v36 = vand.u32 2147483648, %v579_v30  ;;  %vm585_vm13 = vweird.f32 %v579_v30  ;;  %v589_v37 = vand.u32 2147483647, %v579_v30 }
 0xe40   :  { %v762_v5 = vadd.f32 %v1320_v48, %v761_v25 }
 0xe41   :  { %v749_v26 = vpop.f32.mrf.mxu1  ;;  %v592_v39 = vor.u32 1.1754944e-38, %v591_v36  ;;  %vm590_vm15 = vcmp.eq.f32.partialorder %v589_v37, 8.507059e+37 }
 0xe42   :  { %775 = vst [vmem:[#allocation8 + $0x28] sm:$0xff] %v762_v5  ;;  %v750_v7 = vadd.f32 %v1320_v48, %v749_v26 }
 0xe44   :  { %771 = vst [vmem:[#allocation8 + $0x8] sm:$0xff] %v750_v7 }
 0xe45   :  { %v938_v31 = vpop.eup %937 }
 0xe46   :  { %v581_v32 = vmul.f32 %v938_v31, %v579_v30  ;;  %vm586_vm12 = vweird.f32 %v938_v31 }
 0xe47   :  { %vm587_vm14 = vmor %vm585_vm13, %vm586_vm12 }
 0xe48   :  { %v582_v33 = vsub.f32 1.0, %v581_v32 }
 0xe49   :  { %v752_v27 = vpop.f32.mrf.mxu1 }
 0xe4a   :  { %v753_v46 = vadd.f32 %v1320_v48, %v752_v27  ;;  %v583_v34 = vmul.f32 %v938_v31, %v582_v33 }
 0xe4c   :  { %772 = vst [vmem:[#allocation8 + $0x10] sm:$0xff] %v753_v46  ;;  %v584_v35 = vadd.f32 %v938_v31, %v583_v34 }
 0xe4e   :  { %v588_v38 = vsel %vm587_vm14, %v938_v31, %v584_v35 }
 0xe4f   :  { %v593_v41 = vsel %vm590_vm15, %v592_v39, %v588_v38 }
 0xe50   :  { %v596_v43 = vmul.f32 %v593_v41, %v541_v11 }
 0xead   :  { %v599_v40 = vpop.permute.xlu1 %598 }
 0xeae   :  { %v601_v42 = vmul.f32 %v599_v40, %v593_v41 }
 0xeb0   :  { %603 = vrot.lane.b32.xlu2 %v601_v42, %s1080_s25 }
 0xf0a   :  { %v604_v44 = vpop.permute.xlu2 %603 }
 0xf0b   :  { %v606_v45 = vadd.f32 %v604_v44, %v596_v43 }
 0xf0d   :  { %939 = vtanh.f32 %v606_v45 }
 0xf13   :  { %v940_v49 = vpop.eup %939 }
 0xf14   :  { %609 = vrot.lane.b32.xlu0 %v940_v49, %s1079_s24 }
 0xf86   :  { %v610_v50 = vpop.permute.xlu0 %609 }
 0xf87   :  { %v612_v51 = vmul.f32 %v610_v50, %v593_v41 }
 0xf89   :  { %614 = vrot.lane.b32.xlu1 %v612_v51, %s1080_s25 }
 0xffb   :  { %v615_v52 = vpop.permute.xlu1 %614 }
 0xffc   :  { %617 = vst.msk [vmem:[#allocation2 + $0x30] sm:$0xff] %vm157_vm1, %v615_v52  ;;  %852 = vmatmul.msk.f32.vlgmr.msra.gmra.mxu2 %vm157_vm1, %v615_v52 }
0x1003   :  { %v695_v53 = vld [vmem:[#allocation2 + $0x30] sm:$0xff] }
0x1004   :  { %860 = vmatmul.msk.f32.gmra.mxu3 %vm157_vm1, %v695_v53 }
0x107f   :  { %v637_v55 = vpop.f32.mrf.mxu2 }
0x1080   :  { %v640_v56 = vadd.f32 %v637_v55, %v149_v54 }
0x1082   :  { %941 = vtanh.f32 %v640_v56  ;;  %v853_v60 = vmul.f32 -1.442695, %v640_v56 }
0x1084   :  { %943 = vpow2.f32 %v853_v60 }
0x1087   :  { %v764_v57 = vpop.f32.mrf.mxu3 }
0x1088   :  { %v942_v58 = vpop.eup %941  ;;  %v765_v59 = vadd.f32 %v1320_v48, %v764_v57 }
0x1089   :  { %663 = vrot.lane.b32.xlu2 %v942_v58, %s1079_s24 }
0x108a   :  { %776 = vst [vmem:[#allocation8 + $0x30] sm:$0xff] %v765_v59  ;;  %v944_v61 = vpop.eup %943 }
0x108b   :  { %v644_v62 = vadd.f32 1.0, %v944_v61 }
0x108d   :  { %945 = vrcp.f32 %v644_v62  ;;  %v656_v47 = vand.u32 2147483648, %v644_v62  ;;  %vm650_vm3 = vweird.f32 %v644_v62  ;;  %v654_v6 = vand.u32 2147483647, %v644_v62 }
0x108f   :  { %v657_v9 = vor.u32 1.1754944e-38, %v656_v47  ;;  %vm655_vm5 = vcmp.eq.f32.partialorder %v654_v6, 8.507059e+37 }
0x1093   :  { %v946_v63 = vpop.eup %945 }
0x1094   :  { %v646_v0 = vmul.f32 %v946_v63, %v644_v62  ;;  %vm651_vm0 = vweird.f32 %v946_v63 }
0x1095   :  { %vm652_vm4 = vmor %vm650_vm3, %vm651_vm0 }
0x1096   :  { %v647_v1 = vsub.f32 1.0, %v646_v0 }
0x1098   :  { %v648_v3 = vmul.f32 %v946_v63, %v647_v1 }
0x109a   :  { %v649_v13 = vadd.f32 %v946_v63, %v648_v3 }
0x109c   :  { %v653_v8 = vsel %vm652_vm4, %v946_v63, %v649_v13 }
0x109d   :  { %v658_v11 = vsel %vm655_vm5, %v657_v9, %v653_v8 }
0x109e   :  { %v661_v14 = vmul.f32 %v658_v11, %v606_v45 }
0x10e3   :  { %v664_v10 = vpop.permute.xlu2 %663 }
0x10e4   :  { %v666_v12 = vmul.f32 %v664_v10, %v658_v11 }
0x10e6   :  { %668 = vrot.lane.b32.xlu0 %v666_v12, %s1080_s25 }
0x1158   :  { %v669_v15 = vpop.permute.xlu0 %668 }
0x1159   :  { %v671_v16 = vadd.f32 %v669_v15, %v661_v14 }
0x115b   :  { %947 = vtanh.f32 %v671_v16  ;;  %685 = vrot.lane.b32.xlu0 %v671_v16, %s1081_s5 }
0x1161   :  { %v948_v17 = vpop.eup %947 }
0x1162   :  { %674 = vrot.lane.b32.xlu1 %v948_v17, %s1079_s24  ;;  %s798_s24 = sshll.u32 %s1378_s9, 4  ;;  %s1085_s9 = smov 128   ;;  %s799_s24 = int_to_ptr.hbm [resolvable:$true] %s798_s24 }
0x11cd   :  { %v686_v18 = vpop.permute.xlu0 %685 }
0x11ce   :  { %688 = vst.msk [vmem:[#allocation11] sm:$0xff] %vm157_vm1, %v686_v18 }
0x11d4   :  { %v675_v19 = vpop.permute.xlu1 %674 }
0x11d5   :  { %v677_v20 = vmul.f32 %v675_v19, %v658_v11 }
0x11d7   :  { %679 = vrot.lane.b32.xlu2 %v677_v20, %s1080_s25 }
0x1231   :  { %v680_v21 = vpop.permute.xlu2 %679 }
0x1232   :  { %682 = vst.msk [vmem:[#allocation2 + $0x38] sm:$0xff] %vm157_vm1, %v680_v21 }
0x1233   :  { %683 = vst.msk [vmem:[#allocation9] sm:$0xff] %vm157_vm1, %v680_v21 }
0x1234   :  { %801 = dma.vmem_to_hbm [thread:$0]  %s797_s3, 128, %s799_s24, [#allocation10]  }
0x1235   :  { %812 = dma.vmem_to_hbm [thread:$0]  %s808_s28, 128, %s810_s30, [#allocation10]  }
0x1239   :  { %v696_v22 = vld [vmem:[#allocation2 + $0x38] sm:$0xff] }
0x123a   :  { %861 = vmatmul.msk.f32.gmra.mxu3 %vm157_vm1, %v696_v22 }
0x12bd   :  { %v767_v23 = vpop.f32.mrf.mxu3 }
0x12be   :  { %v768_v24 = vadd.f32 %v1320_v48, %v767_v23 }
0x12c0   :  { %777 = vst [vmem:[#allocation8 + $0x38] sm:$0xff] %v768_v24 }
0x12c1   :  { %790 = dma.vmem_to_hbm [thread:$0]  %s783_s12, 1024, %s785_s15, [#allocation5], %s1085_s9, %s1085_s9, %s1086_s16  }
0x12c2   :  { %1073 = dma.done.wait [#allocation5], 1024  }
0x12c3   :  { %1074 = vsyncadd [#allocation5], 4294966272 }
0x12c4   :  { %1075 = dma.done.wait [#allocation10], 256  }
0x12c5   :  { %1076 = vsyncadd [#allocation10], 4294967040 }
0x12c6   :  { %825 = vsyncpa [#allocation4], 1 }
0x12c7   :  { %826 = vsyncpa [#allocation7], 1 }
0x12c8   :  { %827 = vsyncpa [#allocation5], 1 }
0x12c9   :  { %828 = vsyncpa [#allocation10], 1 }

</bundles_post_ra>
